<compile_context>
chip_gen: v6e
topology: v6e:2x2x1
jax: 0.10.0
libtpu: 0.0.40
codegen_flags: <defaults>
</compile_context>

<pallas_src>
import functools

import jax
import jax.numpy as jnp
from jax.experimental import pallas as pl
from jax.experimental.pallas import tpu as pltpu


# ---------------------------------------------------------------------------
# Kernel
# ---------------------------------------------------------------------------

def _se_conv1x1_kernel(x_ref, w_ref, b_ref, o_ref, *, highest_precision):
    """1x1 conv on a lane-dense spatial tile.

    x_ref: VMEM (Bn, C_in, T)      w_ref: VMEM (C_out, C_in)  (x dtype)
    b_ref: VMEM (C_out, 1) f32     o_ref: VMEM (Bn, C_out, T)
    """
    w = w_ref[...]
    b = b_ref[...]                                   # (C_out, 1), broadcasts over T
    prec = jax.lax.Precision.HIGHEST if highest_precision else None
    bn = x_ref.shape[0]
    for n in range(bn):                              # static unroll over images in block
        acc = jnp.dot(w, x_ref[n],                   # (C_out, C_in) @ (C_in, T) on MXU
                      preferred_element_type=jnp.float32,
                      precision=prec)
        o_ref[n] = (acc + b).astype(o_ref.dtype)


# ---------------------------------------------------------------------------
# Tiling planner
# ---------------------------------------------------------------------------

def _plan_tiles(N, C_in, C_out, HW, itemsize, vmem_budget_bytes):
    """Pick (Bn, T) so each grid step moves a large, lane-dense slab."""
    LANE = 128
    CAP_LANES = 65536          # per-step lane cap (review: 32768-131072)
    TARGET_LANES = 16384       # aim for >= this many lanes/step to amortize step overhead

    # Bytes per lane per image for double-buffered input + output blocks.
    per_lane = 2 * (C_in + C_out) * itemsize
    budget_lanes = max(LANE, (vmem_budget_bytes // per_lane) // LANE * LANE)

    if HW <= LANE:
        thw = HW                                     # full (possibly tiny) lane dim
    else:
        hw_r = pl.cdiv(HW, LANE) * LANE              # ragged last block is masked
        thw = min(CAP_LANES, budget_lanes, hw_r)

    # Batch images per step while tiles are small (amortizes overhead, feeds the MXU).
    bn = 1
    if thw < TARGET_LANES and N > 1:
        bn = min(N, max(1, TARGET_LANES // thw))
        bn = max(1, min(bn, budget_lanes // thw))    # stay inside the VMEM budget

    n_b, n_hw = pl.cdiv(N, bn), pl.cdiv(HW, thw)

    # Keep >= 2 grid steps so both v7x TensorCores get work (cheap on 1-TC chips).
    if n_b * n_hw < 2:
        if bn > 1:
            bn = pl.cdiv(N, 2)
        elif thw > LANE and HW > LANE:
            thw = pl.cdiv(pl.cdiv(HW, 2), LANE) * LANE
        n_b, n_hw = pl.cdiv(N, bn), pl.cdiv(HW, thw)

    return bn, thw, n_b, n_hw


# ---------------------------------------------------------------------------
# Wrapper
# ---------------------------------------------------------------------------

def se_forward(x_nchw, weight, bias):
    """1x1 conv (SE.convert) via Pallas, computed directly in NCHW layout.

    x_nchw: (N, C_in, H, W)   weight: (C_out, C_in)   bias: (C_out,)
    returns: (N, C_out, H, W)
    """
    N, C_in, H, W = x_nchw.shape
    C_out = weight.shape[0]
    HW = H * W

    # Free, contiguous reshape — no transpose / HBM round trip.
    x = x_nchw.reshape(N, C_in, HW)
    itemsize = jnp.dtype(x.dtype).itemsize

    # Generation-aware VMEM budget (v5e/v6e: 128 MiB physical, v7x: 64 MiB).
    try:
        phys_vmem = int(pltpu.get_tpu_info().vmem_capacity_bytes)
    except Exception:
        phys_vmem = 64 * 1024 * 1024                 # conservative (v7x) fallback
    vmem_limit = min((phys_vmem * 3) // 4, 100 * 1024 * 1024)
    plan_budget = (vmem_limit * 3) // 4              # headroom: resident W/b + scratch

    bn, thw, n_b, n_hw = _plan_tiles(N, C_in, C_out, HW, itemsize, plan_budget)

    # Single precision policy: operands in x dtype, f32 bias + f32 accumulation.
    w_v = weight.astype(x.dtype)
    b_v = bias.reshape(C_out, 1).astype(jnp.float32)

    kernel = functools.partial(
        _se_conv1x1_kernel,
        highest_precision=(jnp.dtype(x.dtype) == jnp.dtype(jnp.float32)),
    )

    cost = pl.CostEstimate(
        flops=2 * N * HW * C_in * C_out,
        transcendentals=0,
        bytes_accessed=(N * HW * (C_in + C_out) + C_out * (C_in + 1)) * itemsize,
    )

    out = pl.pallas_call(
        kernel,
        out_shape=jax.ShapeDtypeStruct((N, C_out, HW), x.dtype),
        grid_spec=pltpu.PrefetchScalarGridSpec(
            num_scalar_prefetch=0,
            grid=(n_b, n_hw),
            in_specs=[
                pl.BlockSpec((bn, C_in, thw), lambda b, j: (b, 0, j)),
                pl.BlockSpec((C_out, C_in), lambda b, j: (0, 0)),   # resident weights
                pl.BlockSpec((C_out, 1), lambda b, j: (0, 0)),      # resident bias
            ],
            out_specs=pl.BlockSpec((bn, C_out, thw), lambda b, j: (b, 0, j)),
        ),
        compiler_params=pltpu.CompilerParams(
            dimension_semantics=("parallel", "parallel"),  # megacore sharding on v7x
            vmem_limit_bytes=vmem_limit,
        ),
        cost_estimate=cost,
    )(x, w_v, b_v)

    return out.reshape(N, C_out, H, W)               # free reshape back to NCHW


# ---------------------------------------------------------------------------
# Self-test
# ---------------------------------------------------------------------------

if __name__ == "__main__":
    key = jax.random.PRNGKey(0)
    k_x, k_w, k_b = jax.random.split(key, 3)

    N, C_in, C_out, H, W = 2, 4, 8, 16, 16

    x = jax.random.normal(k_x, (N, C_in, H, W), dtype=jnp.float32)
    # Parameters match nn.Conv2d(in_channel, out_channel, 1):
    # weight (C_out, C_in, 1, 1) squeezed to (C_out, C_in); bias (C_out,).
    weight = jax.random.normal(k_w, (C_out, C_in), dtype=jnp.float32) * 0.1
    bias = jax.random.normal(k_b, (C_out,), dtype=jnp.float32) * 0.1

    y = se_forward(x, weight, bias)
    y = jax.block_until_ready(y)

    # Reference (full precision, matches the f32 MXU contraction).
    y_ref = jnp.einsum("nchw,oc->nohw", x, weight,
                       precision=jax.lax.Precision.HIGHEST)
    y_ref = y_ref + bias[None, :, None, None]

    assert y.shape == (N, C_out, H, W)
    assert jnp.allclose(y, y_ref, atol=1e-4, rtol=1e-4), "mismatch vs reference"

    print("KERNEL_OK")
</pallas_src>

<mosaic_0001>
module attributes {stable_mosaic.version = 11 : i64} {
  func.func @_se_conv1x1_kernel(%arg0: i32, %arg1: i32, %arg2: memref<1x4x256xf32, #tpu.memory_space<vmem>>, %arg3: memref<8x4xf32, #tpu.memory_space<vmem>>, %arg4: memref<8x1xf32, #tpu.memory_space<vmem>>, %arg5: memref<1x8x256xf32, #tpu.memory_space<vmem>>) attributes {dimension_semantics = [#tpu.dimension_semantics<parallel>, #tpu.dimension_semantics<parallel>], iteration_bounds = array<i64: 2, 1>, scalar_prefetch = 0 : i64, scratch_operands = 0 : i64, tpu.core_type = #tpu.core_type<tc>, window_params = [{transform_indices = @transform_0, window_bounds = array<i64: 1, 4, 256>}, {pipeline_mode = #tpu.pipeline_mode<synchronous>, transform_indices = @transform_1, window_bounds = array<i64: 8, 4>}, {pipeline_mode = #tpu.pipeline_mode<synchronous>, transform_indices = @transform_2, window_bounds = array<i64: 8, 1>}, {transform_indices = @transform_3, window_bounds = array<i64: 1, 8, 256>}]} {
    %c0 = arith.constant 0 : index
    %c0_0 = arith.constant 0 : index
    %0 = vector.load %arg3[%c0, %c0_0] : memref<8x4xf32, #tpu.memory_space<vmem>>, vector<8x4xf32>
    %c0_1 = arith.constant 0 : index
    %c0_2 = arith.constant 0 : index
    %1 = vector.load %arg4[%c0_1, %c0_2] : memref<8x1xf32, #tpu.memory_space<vmem>>, vector<8x1xf32>
    %c0_3 = arith.constant 0 : index
    %c0_4 = arith.constant 0 : index
    %c0_5 = arith.constant 0 : index
    %2 = vector.load %arg2[%c0_3, %c0_4, %c0_5] : memref<1x4x256xf32, #tpu.memory_space<vmem>>, vector<1x4x256xf32>
    %3 = vector.shape_cast %2 : vector<1x4x256xf32> to vector<4x256xf32>
    %cst = arith.constant dense<0.000000e+00> : vector<8x256xf32>
    %4 = tpu.matmul %0, %3, %cst {dimension_numbers = #tpu.dot_dimension_numbers<[1], [0], [0], [1], [0, 0, 1, 1], [], []>, precision = #tpu.contract_precision<fp32>} : vector<8x4xf32>, vector<4x256xf32>, vector<8x256xf32> -> vector<8x256xf32>
    %5 = vector.broadcast %1 : vector<8x1xf32> to vector<8x256xf32>
    %6 = arith.addf %4, %5 : vector<8x256xf32>
    %c0_6 = arith.constant 0 : index
    %c0_7 = arith.constant 0 : index
    %c0_8 = arith.constant 0 : index
    %7 = vector.load %arg5[%c0_6, %c0_7, %c0_8] : memref<1x8x256xf32, #tpu.memory_space<vmem>>, vector<1x8x256xf32>
    %8 = vector.shape_cast %7 : vector<1x8x256xf32> to vector<8x256xf32>
    %9 = vector.shape_cast %6 : vector<8x256xf32> to vector<1x8x256xf32>
    tpu.vector_store %arg5[%c0_6, %c0_7, %c0_8], %9 {strides = array<i32>} : memref<1x8x256xf32, #tpu.memory_space<vmem>>, vector<1x8x256xf32>,
    return
  }
  func.func @transform_0(%arg0: i32, %arg1: i32) -> (i32, i32, i32) {
    %c0_i32 = arith.constant 0 : i32
    %c0_i32_0 = arith.constant 0 : i32
    return %arg0, %c0_i32, %arg1 : i32, i32, i32
  }
  func.func @transform_1(%arg0: i32, %arg1: i32) -> (i32, i32) {
    %c0_i32 = arith.constant 0 : i32
    %c0_i32_0 = arith.constant 0 : i32
    %c0_i32_1 = arith.constant 0 : i32
    return %c0_i32, %c0_i32_0 : i32, i32
  }
  func.func @transform_2(%arg0: i32, %arg1: i32) -> (i32, i32) {
    %c0_i32 = arith.constant 0 : i32
    %c0_i32_0 = arith.constant 0 : i32
    %c0_i32_1 = arith.constant 0 : i32
    return %c0_i32, %c0_i32_0 : i32, i32
  }
  func.func @transform_3(%arg0: i32, %arg1: i32) -> (i32, i32, i32) {
    %c0_i32 = arith.constant 0 : i32
    %c0_i32_0 = arith.constant 0 : i32
    return %arg0, %c0_i32, %arg1 : i32, i32, i32
  }
}

</mosaic_0001>

<bundles_post_ra>
// kernel: tpu_custom_call.1
= control target key start
LH: loop header
LB: loop body
LE: loop exit
PB: predicated region body
PF: predicated region fallthrough
CT: control target
= control target key end

     0   :  { %8 = vsyncpa [#allocation3], 0  ;;  %s1059_s0 = inlined_call_operand.vmem [shape: f32[2,4,256], index: 0, kind: input, shape index: {}]   ;;  %s1060_s1 = inlined_call_operand.vmem [shape: f32[8,4], index: 1, kind: input, shape index: {}]   ;;  %s1061_s2 = inlined_call_operand.vmem [shape: f32[8,1], index: 2, kind: input, shape index: {}]   ;;  %s1062_s3 = inlined_call_operand.hbm [shape: f32[2,8,256], index: 3, kind: output, shape index: {}]  }
   0x1   :  { %10 = vsyncpa [#allocation3 + $0x1], 0  ;;  %s954_s12 = smov 0   ;;  %s956_s13 = smov 0  }
   0x2   :  { %s958_s14 = smov 0   ;;  %s960_s15 = smov 0  }
   0x3   :  { %s962_s16 = smov 0   ;;  %s964_s17 = smov 0  }
   0x4 LB: > { %s779_s18 = sadd.s32 4294967295, %s929_s17   ;;  %s780_s19 = sadd.s32 4294967294, %s929_s17   ;;  %s929_s17 = sphi %s964_s17, %s16_s17   ;;  %s925_s16 = sphi %s962_s16, %s1069_s16   ;;  %s921_s15 = sphi %s960_s15, %s1068_s15   ;;  %s917_s14 = sphi %s958_s14, %s1067_s14   ;;  %s913_s13 = sphi %s956_s13, %s1066_s13   ;;  %s909_s12 = sphi %s954_s12, %s1065_s12  }
   0x5   : > { %s28_s20 = sadd.s32 1, %s925_s16  ;;  %s107_s21 = sadd.s32 1, %s917_s14 }
   0x6   : > { %p30_p0 = scmp.ge.s32.totalorder %s28_s20, 2  ;;  %p117_p1 = scmp.ne.s32.totalorder %s917_s14, %s913_s13 }
   0x7   : > { %p118_p2 = scmp.eq.s32.totalorder %s779_s18, 1  ;;  %p123_p3 = scmp.ne.s32.totalorder %s913_s13, %s909_s12 }
   0x8   : > { %s1071_s20 = smov (%p30_p0, %s28_s20), 0  ;;  %p124_p5 = scmp.eq.s32.totalorder %s780_s19, 1 }
   0x9   : > { %p994_p4 = por %p118_p2, %p117_p1  ;;  %s102_s23 = ssub.s32 %s925_s16, %s1071_s20 }
   0xa   : > { %p783_p6 = scmp.ge.s32.totalorder %s929_s17, 1  ;;  %p105_p7 = scmp.eq.s32.totalorder %s102_s23, 0 }
   0xb   : > { %p1001_p8 = por %p124_p5, %p123_p3  ;;  %p161_p9 = scmp.lt.s32.totalorder %s929_s17, 3 }
   0xc   : > { %s1007_s25 = scalar_select %p105_p7, %s917_s14, %s107_s21  }
   0xd   : > { %p162_p10 = pnand %p783_p6, %p161_p9 }
   0xe   : > { %p190_p11 = scmp.lt.s32.totalorder (!%p162_p10), %s921_s15, 1  ;;  %s186_s8 = sand.u32 (!%p162_p10), 1, %s913_s13  }
   0xf   : > { %165 = sbr.rel (%p162_p10) target bundleno = 258 (0x102), region = 32  ;;  %s784_s9 = sshll.u32 (!%p162_p10), %s186_s8, 4 }
  0x10   : > { %s793_s10 = sshll.u32 (!%p162_p10), %s921_s15, 8  ;;  %s188_s11 = scalar_lea.vmem (!%p162_p10), [#allocation2], %s784_s9 }
  0x11   : > { %s703_s18 = sshll.u32 (!%p162_p10), %s188_s11, 4  ;;  %s701_s23 = scalar_lea.hbm (!%p162_p10), %s1062_s3, %s793_s10  ;;  %s704_s18 = int_to_ptr.vmem [resolvable:$true] %s703_s18 }
  0x12   : > { %s687_s26 = scalar_lea.sflag (!%p162_p10), [#allocation3], %s186_s8  ;;  %s853_s27 = scalar_lea.vmem (!%p162_p10), %s704_s18, 256 }
  0x13   : > { %p854_p12 = scmp.ne.s32.totalorder (!%p162_p10), %s704_s18, %s853_s27 }
  0x14   : > { %v200_v0 = vld [vmem:[%s1060_s1] sm:$0xff]  ;;  %vm210_vm0 = vcmask 31744   ;;  %v931_v1 = vmov 0.0   ;;  %s191_s30 = scalar_select %p190_p11, %s921_s15, 1  ;;  %v932_v5 = vmov 0   ;;  %vm214_vm1 = vcmask 1043456  }
  0x15   : > { %285 = vmatprep.mubr.f32.mxu0 %v931_v1  ;;  %v212_v2 = vsel %vm210_vm0, %v200_v0, 0  ;;  %371 = vmatprep.mubr.f32.mxu1 %v931_v1  ;;  %v201_v3 = vld [vmem:[%s1061_s2] sm:$0xff]  ;;  %p855_p13 = pnand %p854_p12, %p994_p4  ;;  %s933_s15 = smov [#allocation2]  }
  0x16   : > { %v286_v4 = vand.u32 4294901760, %v212_v2  ;;  %851 = vset.pattern.permute.xlu0 %v932_v5  ;;  %s792_s4 = sshll.u32 %s191_s30, 3  ;;  %s857_s28 = sshll.u32 %s933_s15, 4  ;;  %s858_s28 = int_to_ptr.vmem [resolvable:$false] %s857_s28 }
  0x17   : > { %205 = vperm.xlu0 %851, %v201_v3   ;;  %s197_s7 = scalar_lea.vmem %s1059_s0, %s792_s4  ;;  %p856_p0 = pneg %p855_p13 }
  0x18   : > { %v287_v6 = vsub.f32 %v212_v2, %v286_v4  ;;  %v202_v7 = vld [vmem:[%s197_s7] sm:$0xff]  ;;  %s859_s29 = scalar_lea.vmem %s858_s28, 512  ;;  %p860_p1 = scmp.lt.s32.totalorder %s704_s18, %s858_s28 }
  0x19   : > { %v209_v9 = vcombine.high %v202_v7, %v202_v7  ;;  %v215_v10 = vsel %vm214_vm1, %v202_v7, 0  ;;  %p861_p2 = scmp.lt.s32.totalorder %s859_s29, %s853_s27 }
  0x1a   : > { %v288_v8 = vand.u32 4294901760, %v287_v6  ;;  %v251_v11 = vand.u32 4294901760, %v215_v10 }
  0x1b   : > { %v217_v13 = vsel %vm214_vm1, %v209_v9, 0  ;;  %p862_p3 = por %p861_p2, %p860_p1 }
  0x1c   : > { %v289_v12 = vsub.f32 %v287_v6, %v288_v8  ;;  %v249_v14 = vand.u32 4294901760, %v217_v13  ;;  %v334_v16 = vsub.f32 %v215_v10, %v251_v11 }
  0x1d   : > { %p863_p5 = pnand %p862_p3, %p856_p0 }
  0x1e   : > { %v290_v15 = vand.u32 4294901760, %v289_v12  ;;  %250 = vmatprep.subr.mxu0 %v249_v14  ;;  %v328_v17 = vsub.f32 %v217_v13, %v249_v14  ;;  %v335_v18 = vand.u32 4294901760, %v334_v16 }
  0x1f   : > { %252 = vmatpush1.msra.mxu0 %v251_v11 }
  0x20   : > { %291 = vmatmul.mubr.f32.vlgmr.msra.gmra.mxu0 %v290_v15  ;;  %v329_v19 = vand.u32 4294901760, %v328_v17  ;;  %411 = vmatprep.subr.mxu0 %v328_v17  ;;  %v336_v20 = vsub.f32 %v334_v16, %v335_v18 }
  0x21   : > { %414 = vmatpush1.msra.mxu0 %v334_v16  ;;  %447 = vmatprep.mubr.f32.mxu0 %v931_v1 }
  0x22   : > { %v330_v21 = vsub.f32 %v328_v17, %v329_v19  ;;  %565 = vmatprep.subr.mxu0 %v329_v19  ;;  %v337_v22 = vand.u32 4294901760, %v336_v20 }
  0x24   : > { %v331_v23 = vand.u32 4294901760, %v330_v21  ;;  %450 = vmatmul.mubr.f32.vlgmr.msra.gmra.mxu0 %v287_v6 }
  0x25   : > { %569 = vmatpush1.msra.mxu0 %v335_v18  ;;  %602 = vmatprep.mubr.f32.mxu0 %v931_v1 }
  0x26   : > { %332 = vmatprep.subr.mxu1 %v331_v23 }
  0x27   : > { %338 = vmatpush1.msra.mxu1 %v337_v22 }
  0x28   : > { %373 = vmatmul.mubr.f32.vlgmr.msra.gmra.mxu1 %v286_v4  ;;  %487 = vmatprep.subr.mxu1 %v249_v14 }
  0x29   : > { %489 = vmatpush1.msra.mxu1 %v251_v11  ;;  %522 = vmatprep.mubr.f32.mxu1 %v931_v1 }
  0x2a   : > { %641 = vmatprep.subr.mxu1 %v249_v14  ;;  %604 = vmatmul.mubr.f32.vlgmr.msra.gmra.mxu0 %v286_v4 }
  0x2c   : > { %526 = vmatmul.mubr.f32.vlgmr.msra.gmra.mxu1 %v288_v8 }
  0x2d   : > { %643 = vmatpush1.msra.mxu1 %v251_v11  ;;  %676 = vmatprep.mubr.f32.mxu1 %v931_v1 }
  0x30   : > { %678 = vmatmul.mubr.f32.vlgmr.msra.gmra.mxu1 %v286_v4 }
  0x92   : > { %v206_v25 = vpop.permute.xlu0 %205 }
  0xe0   : > { %v292_v24 = vpop.f32.mrf.mxu0 }
  0xe1   : > { %v293_v28 = vadd.f32 %v292_v24, %v206_v25 }
  0xe2   : > { %v294_v26 = vpop.f32.mrf.mxu0 }
  0xe3   : > { %v295_v31 = vadd.f32 %v294_v26, %v206_v25 }
  0xe4   : > { %v451_v27 = vpop.f32.mrf.mxu0 }
  0xe6   : > { %v453_v30 = vpop.f32.mrf.mxu0 }
  0xe8   : > { %v374_v29 = vpop.f32.mrf.mxu1 }
  0xe9   : > { %v375_v32 = vadd.f32 %v374_v29, %v293_v28 }
  0xea   : > { %v376_v33 = vpop.f32.mrf.mxu1  ;;  %v605_v37 = vpop.f32.mrf.mxu0 }
  0xeb   : > { %v452_v34 = vadd.f32 %v451_v27, %v375_v32  ;;  %v377_v35 = vadd.f32 %v376_v33, %v295_v31 }
  0xec   : > { %v527_v36 = vpop.f32.mrf.mxu1  ;;  %v607_v43 = vpop.f32.mrf.mxu0 }
  0xed   : > { %v454_v38 = vadd.f32 %v453_v30, %v377_v35  ;;  %v528_v39 = vadd.f32 %v527_v36, %v452_v34 }
  0xee   : > { %v529_v40 = vpop.f32.mrf.mxu1 }
  0xef   : > { %v606_v41 = vadd.f32 %v605_v37, %v528_v39  ;;  %v530_v42 = vadd.f32 %v529_v40, %v454_v38 }
  0xf0   : > { %v679_v44 = vpop.f32.mrf.mxu1 }
  0xf1   : > { %v608_v45 = vadd.f32 %v607_v43, %v530_v42  ;;  %v680_v46 = vadd.f32 %v679_v44, %v606_v41 }
  0xf2   : > { %v681_v47 = vpop.f32.mrf.mxu1 }
  0xf3   : > { %684 = vst [vmem:[%s188_s11] sm:$0xff] %v680_v46  ;;  %v682_v48 = vadd.f32 %v681_v47, %v608_v45 }
  0xf5   : > { %685 = vst [vmem:[%s188_s11 + $0x8] sm:$0xff] %v682_v48 }
  0xf6   : > { %866 = shalt.err (!%p863_p5)
}
  0xf7   : > { %s867_s30 = scalar_lea.hbm %s701_s23, 256  ;;  %s871_s6 = scalar_lea.hbm %s1062_s3, 512 }
  0xf8   : > { %p868_p6 = scmp.ne.s32.totalorder %s701_s23, %s867_s30  ;;  %p872_p10 = scmp.lt.s32.totalorder %s701_s23, %s1062_s3 }
  0xf9   : > { %p873_p11 = scmp.lt.s32.totalorder %s871_s6, %s867_s30 }
  0xfa   : > { %p869_p7 = pnand %p868_p6, %p994_p4 }
  0xfb   : > { %p874_p12 = por %p873_p11, %p872_p10 }
  0xfc   : > { %p870_p9 = pneg %p869_p7 }
  0xfe   : > { %p875_p13 = pnand %p874_p12, %p870_p9 }
 0x100   : > { %878 = shalt.err (!%p875_p13)
}
 0x101   : > { %794 = dma.vmem_to_hbm [thread:$0]  (%p994_p4), %s704_s18, 256, %s701_s23, %s687_s26  }
 0x102 PF: > { %p800_p0 = scmp.ge.s32.totalorder %s929_s17, 2  ;;  %s715_s9 = sand.u32 1, %s909_s12  }
 0x103   : > { %s716_s10 = scalar_lea.sflag [#allocation3], %s715_s9 }
 0x104   : > { %p797_p1 = pnand %p800_p0, %p1001_p8 }
 0x106   : > { %p798_p2 = pneg %p797_p1 }
 0x108   : > { %904 = dma.done.wait (%p798_p2), %s716_s10, 256  }
 0x109   : > { %906 = vsyncadd (%p798_p2), %s716_s10, 4294967040  ;;  %s16_s17 = sadd.s32 1, %s929_s17   ;;  %s1065_s12 = smov %s913_s13 }
 0x10a   : > { %p13_p3 = scmp.ge.s32.totalorder %s16_s17, 4   ;;  %s1066_s13 = smov %s917_s14 }
 0x10b   : > { %s1067_s14 = smov %s1007_s25  ;;  %s1068_s15 = smov %s925_s16 }
 0x10c   : > { %s1069_s16 = smov %s1071_s20  ;;  %15 = sbr.rel (!%p13_p3) target bundleno = 4 (0x4), region = 67 }
 0x111   :  { %721 = vsyncpa [#allocation3], 1 }
 0x112   :  { %723 = vsyncpa [#allocation3 + $0x1], 1 }

</bundles_post_ra>
